<compile_context>
chip_gen: v6e
topology: v6e:2x2x1
jax: 0.10.0
libtpu: 0.0.40
codegen_flags: <defaults>
</compile_context>

<pallas_src>
import functools

import jax
import jax.numpy as jnp
from jax.experimental import pallas as pl
from jax.experimental.pallas import tpu as pltpu

LANE = 128      # lane width: batch tiles are multiples of this when grid > 1
SUBLANE = 8     # f32 sublane count: hidden dim is padded to a multiple of this


def _round_up(x, m):
    return (x + m - 1) // m * m


def _num_tensorcores():
    """Best-effort TensorCore count per device (2 on v7x / v4 / v5p)."""
    try:
        kind = jax.devices()[0].device_kind.lower()
    except Exception:
        return 1
    return 2 if ("v7" in kind or "v4" in kind or "v5p" in kind) else 1


def _choose_tiling(batch, block_b):
    """Pick (TB, Bp, grid). Single tile for small batches; otherwise tiles of
    <= block_b rows, rounded to a multiple of 128 so both the lane-dense
    (1, TB) output block and the (in_dim, TB) input block satisfy the TPU
    block-shape rules; >=2 (a multiple of n_cores) tiles on 2-TC chips."""
    n_cores = _num_tensorcores()
    tiles = 1
    if batch > block_b:
        tiles = pl.cdiv(batch, block_b)
    if n_cores > 1 and batch >= 2 * LANE:
        tiles = _round_up(max(tiles, n_cores), n_cores)
    if tiles == 1:
        tb = _round_up(batch, SUBLANE)
    else:
        tb = _round_up(pl.cdiv(batch, tiles), LANE)
    bp = _round_up(batch, tb)
    return tb, bp, bp // tb


def critic_kernel(xt_ref, w1t_ref, b1_ref, w2t_ref, b2_ref, w3_ref, b3_ref,
                  out_ref):
    """One batch tile (batch on the lane axis); weights stay VMEM-resident."""
    mm_dtype = w1t_ref.dtype                       # f32, or bf16 fast path
    xt = xt_ref[...].astype(mm_dtype)              # (in_dim, TB)

    # Layer 1: single fused dot against the un-split W1^T (the concat was done
    # once on the host side, so there is no split-weight second matmul here).
    h1 = jnp.dot(w1t_ref[...], xt, preferred_element_type=jnp.float32)
    h1 = jnp.maximum(h1 + b1_ref[...], 0.0)        # (HP, TB), f32

    # Layer 2.
    h2 = jnp.dot(w2t_ref[...], h1.astype(mm_dtype),
                 preferred_element_type=jnp.float32)
    h2 = jnp.maximum(h2 + b2_ref[...], 0.0)        # (HP, TB), f32

    # Layer 3 (HP -> 1): VPU multiply + sublane reduction. The result is
    # already lane-dense (1, TB) -> wide stores + contiguous HBM writeback.
    q = jnp.sum(h2 * w3_ref[...], axis=0, keepdims=True) + b3_ref[0]
    out_ref[...] = q.astype(out_ref.dtype)


@functools.partial(jax.jit, static_argnames=("s_dim", "a_dim", "block_b"))
def critic_forward(s, a, kernel_params, *, s_dim, a_dim, block_b=2048):
    """Flatten / concat / transpose / pad on the host side (cheap XLA ops on
    tiny arrays), full MLP in a single Pallas kernel."""
    w1t, b1t, w2t, b2t, w3c, b3s = kernel_params
    s = s.reshape(-1, s_dim).astype(jnp.float32)
    a = a.reshape(-1, a_dim).astype(jnp.float32)
    batch = s.shape[0]
    in_dim = s_dim + a_dim
    hp = w2t.shape[0]

    tb, bp, grid = _choose_tiling(batch, block_b)

    # torch.cat([s, a], dim=1), then batch -> lane axis.
    xt = jnp.concatenate([s, a], axis=1).T                       # (in_dim, B)
    if bp != batch:
        xt = jnp.pad(xt, ((0, 0), (0, bp - batch)))

    # Full-array blocks, same block index every step -> weights stay resident.
    def resident(arr):
        return pl.BlockSpec(arr.shape, lambda i, nd=arr.ndim: (0,) * nd)

    flops = 2 * bp * (in_dim * hp + hp * hp + hp)
    bytes_accessed = (int(xt.size) * 4 + bp * 4
                      + sum(int(w.size) * w.dtype.itemsize
                            for w in (w1t, b1t, w2t, b2t, w3c, b3s)))

    q = pl.pallas_call(
        critic_kernel,
        out_shape=jax.ShapeDtypeStruct((1, bp), jnp.float32),
        grid=(grid,),
        in_specs=[
            pl.BlockSpec((in_dim, tb), lambda i: (0, i)),        # x^T tile
            resident(w1t), resident(b1t),
            resident(w2t), resident(b2t),
            resident(w3c),
            pl.BlockSpec(memory_space=pltpu.MemorySpace.SMEM),   # b3 scalar
        ],
        out_specs=pl.BlockSpec((1, tb), lambda i: (0, i)),       # lane-dense
        compiler_params=pltpu.CompilerParams(
            dimension_semantics=("parallel",),
            vmem_limit_bytes=32 * 1024 * 1024),
        cost_estimate=pl.CostEstimate(
            flops=flops, transcendentals=0, bytes_accessed=int(bytes_accessed)),
    )(xt, w1t, b1t, w2t, b2t, w3c, b3s)

    q = q.reshape(-1, 1)                                         # (Bp, 1)
    return q[:batch] if bp != batch else q


def init_critic_params(key, s_dim, a_dim, hidden_dim):
    """PyTorch nn.Linear default init (U[-1/sqrt(fan_in), +1/sqrt(fan_in)])."""
    def linear(key, fan_in, fan_out):
        kw, kb = jax.random.split(key)
        bound = 1.0 / (fan_in ** 0.5)
        w = jax.random.uniform(kw, (fan_in, fan_out), jnp.float32, -bound, bound)
        b = jax.random.uniform(kb, (1, fan_out), jnp.float32, -bound, bound)
        return w, b

    k1, k2, k3 = jax.random.split(key, 3)
    in_dim = s_dim + a_dim
    w1, b1 = linear(k1, in_dim, hidden_dim)
    w2, b2 = linear(k2, hidden_dim, hidden_dim)
    w3, b3 = linear(k3, hidden_dim, 1)
    return (w1, b1, w2, b2, w3, b3)


def pad_params_for_kernel(params, *, use_bf16=False):
    """One-time repack: transpose weights into the batch-on-lanes layout, pad
    the hidden dim to a sublane multiple (padded rows give relu(0)=0 and zero
    w3 weights -> math unchanged), keep biases/w3/b3 in f32, and optionally
    store the matmul weights in bf16 (v6e/v7x MXU fast path; accum stays f32)."""
    w1, b1, w2, b2, w3, b3 = params
    hidden = w2.shape[0]
    hp = _round_up(hidden, SUBLANE)
    ph = hp - hidden
    mm_dtype = jnp.bfloat16 if use_bf16 else jnp.float32
    w1t = jnp.pad(w1.T, ((0, ph), (0, 0))).astype(mm_dtype)      # (HP, in_dim)
    b1t = jnp.pad(b1.T, ((0, ph), (0, 0)))                       # (HP, 1) f32
    w2t = jnp.pad(w2.T, ((0, ph), (0, ph))).astype(mm_dtype)     # (HP, HP)
    b2t = jnp.pad(b2.T, ((0, ph), (0, 0)))                       # (HP, 1) f32
    w3c = jnp.pad(w3, ((0, ph), (0, 0)))                         # (HP, 1) f32
    b3s = b3.reshape(-1)                                         # (1,)    f32
    return (w1t, b1t, w2t, b2t, w3c, b3s)


if __name__ == "__main__":
    def reference(params, s, a):
        w1, b1, w2, b2, w3, b3 = params
        x = jnp.concatenate([s, a], axis=1)
        h1 = jnp.maximum(x @ w1 + b1, 0.0)
        h2 = jnp.maximum(h1 @ w2 + b2, 0.0)
        return h2 @ w3 + b3

    # --- Test 1: small DDPG-like config (single tile) ------------------------
    s_dim, a_dim, hidden = 16, 8, 32
    batch = 8
    kp, ks, ka = jax.random.split(jax.random.PRNGKey(0), 3)
    params = init_critic_params(kp, s_dim, a_dim, hidden)
    s = jax.random.normal(ks, (batch, s_dim), jnp.float32)
    a = jax.random.normal(ka, (batch, a_dim), jnp.float32)

    kparams = pad_params_for_kernel(params)
    q = jax.block_until_ready(
        critic_forward(s, a, kparams, s_dim=s_dim, a_dim=a_dim))
    q_ref = reference(params, s, a)
    assert q.shape == (batch, 1)
    assert jnp.allclose(q, q_ref, atol=1e-4, rtol=1e-4)

    # --- Test 2: multi-tile grid + batch padding + unpadded hidden (H=128) ---
    s_dim2, a_dim2, hidden2 = 16, 8, 128
    batch2 = 600
    kp2, ks2, ka2 = jax.random.split(jax.random.PRNGKey(1), 3)
    params2 = init_critic_params(kp2, s_dim2, a_dim2, hidden2)
    s2 = jax.random.normal(ks2, (batch2, s_dim2), jnp.float32)
    a2 = jax.random.normal(ka2, (batch2, a_dim2), jnp.float32)
    kparams2 = pad_params_for_kernel(params2)
    q2 = jax.block_until_ready(
        critic_forward(s2, a2, kparams2, s_dim=s_dim2, a_dim=a_dim2,
                       block_b=256))
    q2_ref = reference(params2, s2, a2)
    assert q2.shape == (batch2, 1)
    assert jnp.allclose(q2, q2_ref, atol=1e-4, rtol=1e-4)

    # --- Test 3: bf16 matmul-operand fast path (looser tolerance) ------------
    kparams_bf16 = pad_params_for_kernel(params, use_bf16=True)
    q_bf = jax.block_until_ready(
        critic_forward(s, a, kparams_bf16, s_dim=s_dim, a_dim=a_dim))
    assert jnp.allclose(q_bf, q_ref, atol=5e-2, rtol=5e-2)

    print("KERNEL_OK")
</pallas_src>

<mosaic_0001>
module attributes {stable_mosaic.version = 11 : i64} {
  func.func @critic_kernel(%arg0: i32, %arg1: memref<24x8xf32, #tpu.memory_space<vmem>>, %arg2: memref<32x24xf32, #tpu.memory_space<vmem>>, %arg3: memref<32x1xf32, #tpu.memory_space<vmem>>, %arg4: memref<32x32xf32, #tpu.memory_space<vmem>>, %arg5: memref<32x1xf32, #tpu.memory_space<vmem>>, %arg6: memref<32x1xf32, #tpu.memory_space<vmem>>, %arg7: memref<1xf32, #tpu.memory_space<smem>>, %arg8: memref<1x8xf32, #tpu.memory_space<vmem>>) attributes {dimension_semantics = [#tpu.dimension_semantics<parallel>], iteration_bounds = array<i64: 1>, scalar_prefetch = 0 : i64, scratch_operands = 0 : i64, tpu.core_type = #tpu.core_type<tc>, window_params = [{transform_indices = @transform_0, window_bounds = array<i64: 24, 8>}, {pipeline_mode = #tpu.pipeline_mode<synchronous>, transform_indices = @transform_1, window_bounds = array<i64: 32, 24>}, {pipeline_mode = #tpu.pipeline_mode<synchronous>, transform_indices = @transform_2, window_bounds = array<i64: 32, 1>}, {pipeline_mode = #tpu.pipeline_mode<synchronous>, transform_indices = @transform_3, window_bounds = array<i64: 32, 32>}, {pipeline_mode = #tpu.pipeline_mode<synchronous>, transform_indices = @transform_4, window_bounds = array<i64: 32, 1>}, {pipeline_mode = #tpu.pipeline_mode<synchronous>, transform_indices = @transform_5, window_bounds = array<i64: 32, 1>}, {transform_indices = @transform_6, window_bounds = array<i64: 1>}, {transform_indices = @transform_7, window_bounds = array<i64: 1, 8>}]} {
    %c0 = arith.constant 0 : index
    %c0_0 = arith.constant 0 : index
    %0 = vector.load %arg1[%c0, %c0_0] : memref<24x8xf32, #tpu.memory_space<vmem>>, vector<24x8xf32>
    %c0_1 = arith.constant 0 : index
    %c0_2 = arith.constant 0 : index
    %1 = vector.load %arg2[%c0_1, %c0_2] : memref<32x24xf32, #tpu.memory_space<vmem>>, vector<32x24xf32>
    %cst = arith.constant dense<0.000000e+00> : vector<32x8xf32>
    %2 = tpu.matmul %1, %0, %cst {dimension_numbers = #tpu.dot_dimension_numbers<[1], [0], [0], [1], [0, 0, 1, 1], [], []>} : vector<32x24xf32>, vector<24x8xf32>, vector<32x8xf32> -> vector<32x8xf32>
    %c0_3 = arith.constant 0 : index
    %c0_4 = arith.constant 0 : index
    %3 = vector.load %arg3[%c0_3, %c0_4] : memref<32x1xf32, #tpu.memory_space<vmem>>, vector<32x1xf32>
    %4 = vector.broadcast %3 : vector<32x1xf32> to vector<32x8xf32>
    %5 = arith.addf %2, %4 : vector<32x8xf32>
    %cst_5 = arith.constant 0.000000e+00 : f32
    %6 = vector.broadcast %cst_5 : f32 to vector<32x8xf32>
    %7 = arith.maximumf %5, %6 : vector<32x8xf32>
    %c0_6 = arith.constant 0 : index
    %c0_7 = arith.constant 0 : index
    %8 = vector.load %arg4[%c0_6, %c0_7] : memref<32x32xf32, #tpu.memory_space<vmem>>, vector<32x32xf32>
    %cst_8 = arith.constant dense<0.000000e+00> : vector<32x8xf32>
    %9 = tpu.matmul %8, %7, %cst_8 {dimension_numbers = #tpu.dot_dimension_numbers<[1], [0], [0], [1], [0, 0, 1, 1], [], []>} : vector<32x32xf32>, vector<32x8xf32>, vector<32x8xf32> -> vector<32x8xf32>
    %c0_9 = arith.constant 0 : index
    %c0_10 = arith.constant 0 : index
    %10 = vector.load %arg5[%c0_9, %c0_10] : memref<32x1xf32, #tpu.memory_space<vmem>>, vector<32x1xf32>
    %11 = vector.broadcast %10 : vector<32x1xf32> to vector<32x8xf32>
    %12 = arith.addf %9, %11 : vector<32x8xf32>
    %cst_11 = arith.constant 0.000000e+00 : f32
    %13 = vector.broadcast %cst_11 : f32 to vector<32x8xf32>
    %14 = arith.maximumf %12, %13 : vector<32x8xf32>
    %c0_12 = arith.constant 0 : index
    %c0_13 = arith.constant 0 : index
    %15 = vector.load %arg6[%c0_12, %c0_13] : memref<32x1xf32, #tpu.memory_space<vmem>>, vector<32x1xf32>
    %16 = vector.broadcast %15 : vector<32x1xf32> to vector<32x8xf32>
    %17 = arith.mulf %14, %16 : vector<32x8xf32>
    %cst_14 = arith.constant dense<0.000000e+00> : vector<8xf32>
    %18 = vector.multi_reduction <add>, %17, %cst_14 [0] : vector<32x8xf32> to vector<8xf32>
    %19 = vector.shape_cast %18 : vector<8xf32> to vector<1x8xf32>
    %c0_15 = arith.constant 0 : index
    %20 = memref.load %arg7[%c0_15] : memref<1xf32, #tpu.memory_space<smem>>
    %21 = vector.broadcast %20 : f32 to vector<1x8xf32>
    %22 = arith.addf %19, %21 : vector<1x8xf32>
    %c0_16 = arith.constant 0 : index
    %c0_17 = arith.constant 0 : index
    %23 = vector.load %arg8[%c0_16, %c0_17] : memref<1x8xf32, #tpu.memory_space<vmem>>, vector<1x8xf32>
    tpu.vector_store %arg8[%c0_16, %c0_17], %22 {strides = array<i32>} : memref<1x8xf32, #tpu.memory_space<vmem>>, vector<1x8xf32>,
    return
  }
  func.func @transform_0(%arg0: i32) -> (i32, i32) {
    %c0_i32 = arith.constant 0 : i32
    %c0_i32_0 = arith.constant 0 : i32
    return %c0_i32, %arg0 : i32, i32
  }
  func.func @transform_1(%arg0: i32) -> (i32, i32) {
    %c0_i32 = arith.constant 0 : i32
    %c0_i32_0 = arith.constant 0 : i32
    %c0_i32_1 = arith.constant 0 : i32
    return %c0_i32, %c0_i32_0 : i32, i32
  }
  func.func @transform_2(%arg0: i32) -> (i32, i32) {
    %c0_i32 = arith.constant 0 : i32
    %c0_i32_0 = arith.constant 0 : i32
    %c0_i32_1 = arith.constant 0 : i32
    return %c0_i32, %c0_i32_0 : i32, i32
  }
  func.func @transform_3(%arg0: i32) -> (i32, i32) {
    %c0_i32 = arith.constant 0 : i32
    %c0_i32_0 = arith.constant 0 : i32
    %c0_i32_1 = arith.constant 0 : i32
    return %c0_i32, %c0_i32_0 : i32, i32
  }
  func.func @transform_4(%arg0: i32) -> (i32, i32) {
    %c0_i32 = arith.constant 0 : i32
    %c0_i32_0 = arith.constant 0 : i32
    %c0_i32_1 = arith.constant 0 : i32
    return %c0_i32, %c0_i32_0 : i32, i32
  }
  func.func @transform_5(%arg0: i32) -> (i32, i32) {
    %c0_i32 = arith.constant 0 : i32
    %c0_i32_0 = arith.constant 0 : i32
    %c0_i32_1 = arith.constant 0 : i32
    return %c0_i32, %c0_i32_0 : i32, i32
  }
  func.func @transform_6(%arg0: i32) -> i32 {
    %c0_i32 = arith.constant 0 : i32
    %c0_i32_0 = arith.constant 0 : i32
    return %c0_i32 : i32
  }
  func.func @transform_7(%arg0: i32) -> (i32, i32) {
    %c0_i32 = arith.constant 0 : i32
    %c0_i32_0 = arith.constant 0 : i32
    return %c0_i32, %arg0 : i32, i32
  }
}

</mosaic_0001>

<bundles_post_ra>
// kernel: critic_forward.1
= control target key start
LH: loop header
LB: loop body
LE: loop exit
PB: predicated region body
PF: predicated region fallthrough
CT: control target
= control target key end

     0   :  { %vm59_vm0 = vcmask 195584   ;;  %v427_v3 = vmov 0   ;;  %s552_s0 = inlined_call_operand.vmem [shape: f32[24,8], index: 0, kind: input, shape index: {}]   ;;  %s553_s1 = inlined_call_operand.vmem [shape: f32[32,24], index: 1, kind: input, shape index: {}]   ;;  %s554_s2 = inlined_call_operand.vmem [shape: f32[32,1], index: 2, kind: input, shape index: {}]   ;;  %s555_s3 = inlined_call_operand.vmem [shape: f32[32,32], index: 3, kind: input, shape index: {}]   ;;  %s556_s4 = inlined_call_operand.vmem [shape: f32[32,1], index: 4, kind: input, shape index: {}]   ;;  %s557_s5 = inlined_call_operand.vmem [shape: f32[32,1], index: 5, kind: input, shape index: {}]   ;;  %s558_s6 = inlined_call_operand.<no memory space> [shape: f32[1], index: 6, kind: input, shape index: {}]   ;;  %s559_s7 = inlined_call_operand.hbm [shape: f32[1,8], index: 7, kind: output, shape index: {}]  }
   0x1   :  { %v30_v0 = vld [vmem:[%s552_s0 + $0x10] sm:$0xff]  ;;  %v29_v1 = vld [vmem:[%s552_s0 + $0x8] sm:$0xff]  ;;  %v31_v2 = vld [vmem:[%s553_s1] sm:$0xff]  ;;  %403 = vset.pattern.permute.xlu0 %v427_v3  ;;  %404 = vset.pattern.permute.xlu1 %v427_v3 }
   0x2   :  { %375 = vmatprep.subr.mxu0 %v30_v0  ;;  %v28_v4 = vld [vmem:[%s552_s0] sm:$0xff]  ;;  %381 = vmatprep.mubr.msk.f32.mxu0 %vm59_vm0, %v31_v2  ;;  %v38_v5 = vld [vmem:[%s554_s2 + $0x18] sm:$0xff]  ;;  %v36_v6 = vld [vmem:[%s554_s2 + $0x8] sm:$0xff] }
   0x3   :  { %376 = vmatpush3.msra.mxu0 %v30_v0  ;;  %56 = vperm.xlu0 %403, %v38_v5   ;;  %v32_v7 = vld [vmem:[%s553_s1 + $0x8] sm:$0xff]  ;;  %v37_v8 = vld [vmem:[%s554_s2 + $0x10] sm:$0xff]  ;;  %v35_v10 = vld [vmem:[%s554_s2] sm:$0xff] }
   0x4   :  { %377 = vmatprep.subr.mxu0 %v29_v1  ;;  %v33_v9 = vld [vmem:[%s553_s1 + $0x10] sm:$0xff]  ;;  %46 = vperm.xlu1 %404, %v36_v6  }
   0x5   :  { %378 = vmatpush3.msra.mxu0 %v29_v1 }
   0x6   :  { %379 = vmatprep.subr.mxu0 %v28_v4 }
   0x7   :  { %380 = vmatpush3.msra.mxu0 %v28_v4 }
   0x8   :  { %13 = vsyncpa [#allocation4], 0  ;;  %382 = vmatmul.mubr.msk.f32.vlgmr.msra.gmra.mxu0 %vm59_vm0, %v32_v7  ;;  %51 = vperm.xlu0 %403, %v37_v8   ;;  %v34_v11 = vld [vmem:[%s553_s1 + $0x18] sm:$0xff]  ;;  %v165_v12 = vld [vmem:[%s556_s4] sm:$0xff]  ;;  %vm189_vm1 = vcmask 261120   ;;  %vm319_vm2 = vcmask 64512  }
   0x9   :  { %384 = vmatprep.mubr.msk.f32.mxu0 %vm59_vm0, %v33_v9  ;;  %41 = vperm.xlu1 %404, %v35_v10   ;;  %v166_v13 = vld [vmem:[%s556_s4 + $0x8] sm:$0xff]  ;;  %v167_v14 = vld [vmem:[%s556_s4 + $0x10] sm:$0xff]  ;;  %v168_v15 = vld [vmem:[%s556_s4 + $0x18] sm:$0xff]  ;;  %s428_s19 = smov [#allocation3]   ;;  %vm336_vm3 = vcmask 57344  }
   0xa   :  { %v291_v16 = vld [vmem:[%s557_s5] sm:$0xff]  ;;  %v292_v17 = vld [vmem:[%s557_s5 + $0x8] sm:$0xff]  ;;  %v293_v18 = vld [vmem:[%s557_s5 + $0x10] sm:$0xff]  ;;  %s344_s20 = sshll.u32 %s428_s19, 4  ;;  %s345_s20 = int_to_ptr.vmem [resolvable:$true] %s344_s20 }
   0xb   :  { %v294_v19 = vld [vmem:[%s557_s5 + $0x18] sm:$0xff]  ;;  %v161_v20 = vld [vmem:[%s555_s3] sm:$0xff]  ;;  %v162_v37 = vld [vmem:[%s555_s3 + $0x8] sm:$0xff]  ;;  %s405_s21 = scalar_lea.vmem %s345_s20, 16  ;;  %s409_s22 = scalar_lea.vmem %s345_s20, 32 }
   0xc   :  { %385 = vmatmul.mubr.msk.f32.gmra.mxu0 %vm59_vm0, %v34_v11  ;;  %171 = vperm.xlu0 %403, %v165_v12   ;;  %v163_v38 = vld [vmem:[%s555_s3 + $0x10] sm:$0xff]  ;;  %v164_v39 = vld [vmem:[%s555_s3 + $0x18] sm:$0xff]  ;;  %v334_v12 = vstv %s558_s6  ;;  %p406_p0 = scmp.ne.s32.totalorder %s345_s20, %s405_s21  ;;  %p410_p1 = scmp.lt.s32.totalorder %s345_s20, %s345_s20 }
   0xd   :  { %176 = vperm.xlu1 %404, %v166_v13   ;;  %395 = vmatprep.mubr.msk.f32.mxu1 %vm189_vm1, %v161_v20  ;;  %p411_p2 = scmp.lt.s32.totalorder %s409_s22, %s405_s21 }
   0xf   :  { %p412_p3 = por %p411_p2, %p410_p1 }
  0x10   :  { %181 = vperm.xlu0 %403, %v167_v14  }
  0x11   :  { %186 = vperm.xlu1 %404, %v168_v15   ;;  %p413_p4 = pnand %p412_p3, %p406_p0 }
  0x14   :  { %297 = vperm.xlu0 %403, %v291_v16  }
  0x15   :  { %302 = vperm.xlu1 %404, %v292_v17  }
  0x18   :  { %307 = vperm.xlu0 %403, %v293_v18  }
  0x19   :  { %312 = vperm.xlu1 %404, %v294_v19  }
  0x7e   :  { %v57_v21 = vpop.permute.xlu0 %56 }
  0x7f   :  { %v47_v23 = vpop.permute.xlu1 %46 }
  0x83   :  { %v52_v27 = vpop.permute.xlu0 %51 }
  0x84   :  { %v42_v32 = vpop.permute.xlu1 %41 }
  0x87   :  { %v172_v40 = vpop.permute.xlu0 %171 }
  0x88   :  { %v177_v41 = vpop.permute.xlu1 %176 }
  0x8b   :  { %v182_v42 = vpop.permute.xlu0 %181 }
  0x8c   :  { %v187_v43 = vpop.permute.xlu1 %186 }
  0x8f   :  { %v298_v47 = vpop.permute.xlu0 %297 }
  0x90   :  { %v303_v50 = vpop.permute.xlu1 %302 }
  0x93   :  { %v308_v61 = vpop.permute.xlu0 %307 }
  0x94   :  { %v313_v62 = vpop.permute.xlu1 %312 }
  0xc8   :  { %v383_v22 = vpop.f32.mrf.mxu0 }
  0xc9   :  { %v144_v29 = vadd.f32 %v383_v22, %v47_v23 }
  0xca   :  { %v138_v24 = vpop.f32.mrf.mxu0 }
  0xcb   :  { %v139_v33 = vadd.f32 %v138_v24, %v42_v32  ;;  %v158_v35 = vmax.f32 %v144_v29, 0.0 }
  0xcc   :  { %v386_v25 = vpop.f32.mrf.mxu0 }
  0xcd   :  { %v154_v26 = vadd.f32 %v386_v25, %v57_v21  ;;  %v157_v36 = vmax.f32 %v139_v33, 0.0 }
  0xce   :  { %v148_v28 = vpop.f32.mrf.mxu0 }
  0xcf   :  { %v160_v30 = vmax.f32 %v154_v26, 0.0  ;;  %v149_v31 = vadd.f32 %v148_v28, %v52_v27 }
  0xd1   :  { %v159_v34 = vmax.f32 %v149_v31, 0.0  ;;  %387 = vmatprep.subr.mxu1 %v160_v30 }
  0xd2   :  { %388 = vmatpush3.msra.mxu1 %v160_v30 }
  0xd3   :  { %389 = vmatprep.subr.mxu1 %v159_v34 }
  0xd4   :  { %390 = vmatpush3.msra.mxu1 %v159_v34 }
  0xd5   :  { %391 = vmatprep.subr.mxu1 %v158_v35 }
  0xd6   :  { %392 = vmatpush3.msra.mxu1 %v158_v35 }
  0xd7   :  { %393 = vmatprep.subr.mxu1 %v157_v36 }
  0xd8   :  { %394 = vmatpush3.msra.mxu1 %v157_v36 }
  0xd9   :  { %396 = vmatmul.mubr.msk.f32.vlgmr.msra.gmra.mxu1 %vm189_vm1, %v162_v37 }
  0xda   :  { %398 = vmatprep.mubr.msk.f32.mxu1 %vm189_vm1, %v163_v38 }
  0xdd   :  { %399 = vmatmul.mubr.msk.f32.gmra.mxu1 %vm189_vm1, %v164_v39 }
 0x199   :  { %v397_v44 = vpop.f32.mrf.mxu1 }
 0x19a   :  { %v274_v45 = vadd.f32 %v397_v44, %v177_v41 }
 0x19b   :  { %v268_v46 = vpop.f32.mrf.mxu1 }
 0x19c   :  { %v288_v48 = vmax.f32 %v274_v45, 0.0  ;;  %v269_v49 = vadd.f32 %v268_v46, %v172_v40 }
 0x19d   :  { %v400_v51 = vpop.f32.mrf.mxu1 }
 0x19e   :  { %v287_v52 = vmax.f32 %v269_v49, 0.0  ;;  %v284_v53 = vadd.f32 %v400_v51, %v187_v43  ;;  %v316_v55 = vmul.f32 %v303_v50, %v288_v48 }
 0x19f   :  { %v278_v54 = vpop.f32.mrf.mxu1 }
 0x1a0   :  { %v315_v56 = vmul.f32 %v298_v47, %v287_v52  ;;  %v290_v57 = vmax.f32 %v284_v53, 0.0  ;;  %v279_v58 = vadd.f32 %v278_v54, %v182_v42  ;;  %v321_v63 = vsel %vm319_vm2, %v316_v55, 0.0 }
 0x1a2   :  { %v320_v59 = vsel %vm319_vm2, %v315_v56, 0.0  ;;  %v289_v60 = vmax.f32 %v279_v58, 0.0  ;;  %v318_v0 = vmul.f32 %v313_v62, %v290_v57 }
 0x1a3   :  { %v322_v2 = vadd.f32 %v321_v63, %v320_v59 }
 0x1a4   :  { %v317_v1 = vmul.f32 %v308_v61, %v289_v60  ;;  %v325_v5 = vsel %vm319_vm2, %v318_v0, 0.0 }
 0x1a6   :  { %v323_v3 = vsel %vm319_vm2, %v317_v1, 0.0 }
 0x1a7   :  { %v324_v4 = vadd.f32 %v323_v3, %v322_v2 }
 0x1a9   :  { %v326_v6 = vadd.f32 %v325_v5, %v324_v4 }
 0x1ab   :  { %v327_v7 = vrot.slane %v326_v6, 4 }
 0x1ad   :  { %v328_v8 = vadd.f32 %v327_v7, %v326_v6 }
 0x1af   :  { %v329_v9 = vrot.slane %v328_v8, 2 }
 0x1b1   :  { %v330_v10 = vadd.f32 %v329_v9, %v328_v8 }
 0x1b3   :  { %v331_v11 = vrot.slane %v330_v10, 1 }
 0x1b5   :  { %v332_v13 = vadd.f32 %v331_v11, %v330_v10 }
 0x1b7   :  { %v335_v14 = vadd.f32 %v334_v12, %v332_v13 }
 0x1b9   :  { %337 = vst.msk [vmem:[#allocation3] sm:$0x1] %vm336_vm3, %v335_v14 }
 0x1ba   :  { %416 = shalt.err (!%p413_p4)
}
 0x1bb   :  { %347 = dma.vmem_to_hbm [thread:$0]  %s345_s20, 16, %s559_s7, [#allocation4]  }
 0x1bc   :  { %425 = dma.done.wait [#allocation4], 16  }
 0x1bd   :  { %426 = vsyncadd [#allocation4], 4294967280 }
 0x1be   :  { %351 = vsyncpa [#allocation4], 1 }

</bundles_post_ra>
